<compile_context>
chip_gen: v6e
topology: v6e:2x2x1
jax: 0.10.0
libtpu: 0.0.40
codegen_flags: <defaults>
</compile_context>

<pallas_src>
import jax
import jax.numpy as jnp
from jax.experimental import pallas as pl
from jax.experimental.pallas import tpu as pltpu

LANE = 128        # vreg lane width (last dim)
SUBLANE = 8       # vreg sublane count for f32 (second-to-last dim)

# Conservative working-set budget per grid step (fits v7x's 32 MiB scoped
# default with headroom); the explicit vmem limit we request from Mosaic.
VMEM_BUDGET_BYTES = 24 * 1024 * 1024
VMEM_LIMIT_BYTES = 32 * 1024 * 1024


def _round_up(x: int, m: int) -> int:
    return (x + m - 1) // m * m


def actor_kernel(s_ref, w1_ref, b1_ref, w2_ref, b2_ref, w3_ref, b3_ref, o_ref):
    mm_dt = w1_ref.dtype
    # Layer 1: cast activations to the MXU dtype in VMEM, f32 accumulation.
    x = jnp.dot(s_ref[...].astype(mm_dt), w1_ref[...],
                preferred_element_type=jnp.float32)
    x = jnp.maximum(x + b1_ref[...], 0.0)          # bias + relu in f32 (VPU)
    # Layer 2
    x = jnp.dot(x.astype(mm_dt), w2_ref[...],
                preferred_element_type=jnp.float32)
    x = jnp.maximum(x + b2_ref[...], 0.0)
    # Layer 3 + tanh epilogue (EUP)
    x = jnp.dot(x.astype(mm_dt), w3_ref[...],
                preferred_element_type=jnp.float32)
    o_ref[...] = jnp.tanh(x + b3_ref[...]).astype(o_ref.dtype)


def prepare_actor_params(params, matmul_dtype=jnp.bfloat16):
    """One-time weight prep (hoisted out of the per-step forward call).

    Weights are cast to the MXU-native dtype; biases stay f32 for the
    elementwise tail.  No padding needed: full-array block dims are legal.
    """
    return {
        "w1": params["w1"].astype(matmul_dtype),
        "w2": params["w2"].astype(matmul_dtype),
        "w3": params["w3"].astype(matmul_dtype),
        "b1": params["b1"].astype(jnp.float32).reshape(1, -1),
        "b2": params["b2"].astype(jnp.float32).reshape(1, -1),
        "b3": params["b3"].astype(jnp.float32).reshape(1, -1),
    }


def _pick_tb(B, block_b, in_size, hid_size, out_size):
    """Batch-tile size: >=2 roughly balanced tiles (v7x megacore), VMEM-safe."""
    tb = min(block_b, _round_up(pl.cdiv(B, 2), SUBLANE))
    # Per-step VMEM estimate with lane-padded layouts (conservative):
    # double-buffered s/out tiles + matmul/relu intermediates.
    in_l = _round_up(in_size, LANE)
    hid_l = _round_up(hid_size, LANE)
    out_l = _round_up(out_size, LANE)

    def step_bytes(t):
        return 4 * t * (2 * in_l + 2 * out_l + 3 * hid_l)

    while tb > SUBLANE and step_bytes(tb) > VMEM_BUDGET_BYTES:
        tb = _round_up(tb // 2, SUBLANE)
    return max(tb, SUBLANE)


def actor_forward(s, prepared, *, block_b: int = 2048):
    """s: (B, input_size) f32.  prepared: output of prepare_actor_params.

    Returns (B, output_size) f32, same semantics as the PyTorch Actor.
    """
    w1, b1, w2, b2, w3, b3 = (prepared[k]
                              for k in ("w1", "b1", "w2", "b2", "w3", "b3"))
    B, in_size = s.shape
    hid_size = w1.shape[1]
    out_size = w3.shape[1]

    args = (s, w1, b1, w2, b2, w3, b3)
    out_shape = jax.ShapeDtypeStruct((B, out_size), jnp.float32)

    weight_bytes = sum(a.size * a.dtype.itemsize
                       for a in (w1, b1, w2, b2, w3, b3))
    cost = pl.CostEstimate(
        flops=2 * B * (in_size * hid_size + hid_size * hid_size
                       + hid_size * out_size),
        transcendentals=B * out_size,
        bytes_accessed=B * in_size * 4 + weight_bytes + B * out_size * 4,
    )

    if B <= block_b:
        # Small batch: single gridless call, every operand fully VMEM-resident,
        # no software-pipeline overhead.
        return pl.pallas_call(
            actor_kernel,
            out_shape=out_shape,
            in_specs=[pl.BlockSpec(memory_space=pltpu.MemorySpace.VMEM)] * 7,
            out_specs=pl.BlockSpec(memory_space=pltpu.MemorySpace.VMEM),
            cost_estimate=cost,
        )(*args)

    # Large batch: stream raw f32 batch tiles; weights/biases stay resident
    # (constant block index).  Ragged last tile handled by Pallas (cdiv grid).
    tb = _pick_tb(B, block_b, in_size, hid_size, out_size)
    grid = (pl.cdiv(B, tb),)
    return pl.pallas_call(
        actor_kernel,
        out_shape=out_shape,
        grid=grid,
        in_specs=[
            pl.BlockSpec((tb, in_size), lambda i: (i, 0)),          # s tile
            pl.BlockSpec((in_size, hid_size), lambda i: (0, 0)),    # W1 (resident)
            pl.BlockSpec((1, hid_size), lambda i: (0, 0)),          # b1
            pl.BlockSpec((hid_size, hid_size), lambda i: (0, 0)),   # W2
            pl.BlockSpec((1, hid_size), lambda i: (0, 0)),          # b2
            pl.BlockSpec((hid_size, out_size), lambda i: (0, 0)),   # W3
            pl.BlockSpec((1, out_size), lambda i: (0, 0)),          # b3
        ],
        out_specs=pl.BlockSpec((tb, out_size), lambda i: (i, 0)),
        compiler_params=pltpu.CompilerParams(
            dimension_semantics=("parallel",),
            vmem_limit_bytes=VMEM_LIMIT_BYTES,
        ),
        cost_estimate=cost,
    )(*args)


def init_actor_params(key, input_size, hidden_size, output_size):
    """Deterministic init mimicking nn.Linear's uniform(-1/sqrt(fan_in), ...)."""
    ks = jax.random.split(key, 6)

    def lin(kw, kb, fan_in, fan_out):
        bound = 1.0 / jnp.sqrt(float(fan_in))
        w = jax.random.uniform(kw, (fan_in, fan_out), jnp.float32, -bound, bound)
        b = jax.random.uniform(kb, (1, fan_out), jnp.float32, -bound, bound)
        return w, b

    w1, b1 = lin(ks[0], ks[1], input_size, hidden_size)
    w2, b2 = lin(ks[2], ks[3], hidden_size, hidden_size)
    w3, b3 = lin(ks[4], ks[5], hidden_size, output_size)
    return {"w1": w1, "b1": b1, "w2": w2, "b2": b2, "w3": w3, "b3": b3}


def _reference(s, params):
    x = jnp.maximum(s @ params["w1"] + params["b1"], 0.0)
    x = jnp.maximum(x @ params["w2"] + params["b2"], 0.0)
    return jnp.tanh(x @ params["w3"] + params["b3"])


if __name__ == "__main__":
    key = jax.random.PRNGKey(0)
    k_in, k_p, k_big = jax.random.split(key, 3)

    batch, input_size, hidden_size, output_size = 2, 8, 32, 4
    s = jax.random.normal(k_in, (batch, input_size), jnp.float32)
    params = init_actor_params(k_p, input_size, hidden_size, output_size)
    ref = _reference(s, params)

    # 1) Small batch, f32 matmul path (gridless, everything VMEM-resident).
    prep_f32 = prepare_actor_params(params, matmul_dtype=jnp.float32)
    out_f32 = jax.block_until_ready(actor_forward(s, prep_f32))
    assert out_f32.shape == (batch, output_size)
    assert jnp.allclose(out_f32, ref, atol=1e-5, rtol=1e-5)

    # 2) Small batch, bf16 matmul inputs (f32 accumulate) -- MXU-native path.
    #    (bf16 weights are an intentional precision trade vs the f32 Actor.)
    prep_bf16 = prepare_actor_params(params)          # prepared once, reused
    out_bf16 = jax.block_until_ready(actor_forward(s, prep_bf16))
    assert jnp.allclose(out_bf16, ref, atol=5e-2, rtol=5e-2)

    # 3) Large non-divisible batch exercises the batch-tiled grid path with
    #    resident weights and a ragged last tile (cdiv grid, no host padding).
    big_batch = 1000
    s_big = jax.random.normal(k_big, (big_batch, input_size), jnp.float32)
    ref_big = _reference(s_big, params)
    out_big = jax.block_until_ready(
        actor_forward(s_big, prep_bf16, block_b=256))
    assert out_big.shape == (big_batch, output_size)
    assert jnp.allclose(out_big, ref_big, atol=5e-2, rtol=5e-2)

    print("KERNEL_OK")
</pallas_src>

<mosaic_0001>
module attributes {stable_mosaic.version = 11 : i64} {
  func.func @actor_kernel(%arg0: memref<2x8xf32, #tpu.memory_space<vmem>>, %arg1: memref<8x32xf32, #tpu.memory_space<vmem>>, %arg2: memref<1x32xf32, #tpu.memory_space<vmem>>, %arg3: memref<32x32xf32, #tpu.memory_space<vmem>>, %arg4: memref<1x32xf32, #tpu.memory_space<vmem>>, %arg5: memref<32x4xf32, #tpu.memory_space<vmem>>, %arg6: memref<1x4xf32, #tpu.memory_space<vmem>>, %arg7: memref<2x4xf32, #tpu.memory_space<vmem>>) attributes {dimension_semantics = [], scalar_prefetch = 0 : i64, scratch_operands = 0 : i64, tpu.core_type = #tpu.core_type<tc>} {
    %c0 = arith.constant 0 : index
    %c0_0 = arith.constant 0 : index
    %0 = vector.load %arg0[%c0, %c0_0] : memref<2x8xf32, #tpu.memory_space<vmem>>, vector<2x8xf32>
    %c0_1 = arith.constant 0 : index
    %c0_2 = arith.constant 0 : index
    %1 = vector.load %arg1[%c0_1, %c0_2] : memref<8x32xf32, #tpu.memory_space<vmem>>, vector<8x32xf32>
    %cst = arith.constant dense<0.000000e+00> : vector<2x32xf32>
    %2 = tpu.matmul %0, %1, %cst {dimension_numbers = #tpu.dot_dimension_numbers<[1], [0], [0], [1], [0, 0, 1, 1], [], []>} : vector<2x8xf32>, vector<8x32xf32>, vector<2x32xf32> -> vector<2x32xf32>
    %c0_3 = arith.constant 0 : index
    %c0_4 = arith.constant 0 : index
    %3 = vector.load %arg2[%c0_3, %c0_4] : memref<1x32xf32, #tpu.memory_space<vmem>>, vector<1x32xf32>
    %4 = vector.broadcast %3 : vector<1x32xf32> to vector<2x32xf32>
    %5 = arith.addf %2, %4 : vector<2x32xf32>
    %cst_5 = arith.constant 0.000000e+00 : f32
    %6 = vector.broadcast %cst_5 : f32 to vector<2x32xf32>
    %7 = arith.maximumf %5, %6 : vector<2x32xf32>
    %c0_6 = arith.constant 0 : index
    %c0_7 = arith.constant 0 : index
    %8 = vector.load %arg3[%c0_6, %c0_7] : memref<32x32xf32, #tpu.memory_space<vmem>>, vector<32x32xf32>
    %cst_8 = arith.constant dense<0.000000e+00> : vector<2x32xf32>
    %9 = tpu.matmul %7, %8, %cst_8 {dimension_numbers = #tpu.dot_dimension_numbers<[1], [0], [0], [1], [0, 0, 1, 1], [], []>} : vector<2x32xf32>, vector<32x32xf32>, vector<2x32xf32> -> vector<2x32xf32>
    %c0_9 = arith.constant 0 : index
    %c0_10 = arith.constant 0 : index
    %10 = vector.load %arg4[%c0_9, %c0_10] : memref<1x32xf32, #tpu.memory_space<vmem>>, vector<1x32xf32>
    %11 = vector.broadcast %10 : vector<1x32xf32> to vector<2x32xf32>
    %12 = arith.addf %9, %11 : vector<2x32xf32>
    %cst_11 = arith.constant 0.000000e+00 : f32
    %13 = vector.broadcast %cst_11 : f32 to vector<2x32xf32>
    %14 = arith.maximumf %12, %13 : vector<2x32xf32>
    %c0_12 = arith.constant 0 : index
    %c0_13 = arith.constant 0 : index
    %15 = vector.load %arg5[%c0_12, %c0_13] : memref<32x4xf32, #tpu.memory_space<vmem>>, vector<32x4xf32>
    %cst_14 = arith.constant dense<0.000000e+00> : vector<2x4xf32>
    %16 = tpu.matmul %14, %15, %cst_14 {dimension_numbers = #tpu.dot_dimension_numbers<[1], [0], [0], [1], [0, 0, 1, 1], [], []>} : vector<2x32xf32>, vector<32x4xf32>, vector<2x4xf32> -> vector<2x4xf32>
    %c0_15 = arith.constant 0 : index
    %c0_16 = arith.constant 0 : index
    %17 = vector.load %arg6[%c0_15, %c0_16] : memref<1x4xf32, #tpu.memory_space<vmem>>, vector<1x4xf32>
    %18 = vector.broadcast %17 : vector<1x4xf32> to vector<2x4xf32>
    %19 = arith.addf %16, %18 : vector<2x4xf32>
    %20 = math.tanh %19 : vector<2x4xf32>
    %c0_17 = arith.constant 0 : index
    %c0_18 = arith.constant 0 : index
    %21 = vector.load %arg7[%c0_17, %c0_18] : memref<2x4xf32, #tpu.memory_space<vmem>>, vector<2x4xf32>
    tpu.vector_store %arg7[%c0_17, %c0_18], %20 {strides = array<i32>} : memref<2x4xf32, #tpu.memory_space<vmem>>, vector<2x4xf32>,
    return
  }
}

</mosaic_0001>

<bundles_post_ra>
// kernel: tpu_custom_call.1
= control target key start
LH: loop header
LB: loop body
LE: loop exit
PB: predicated region body
PF: predicated region fallthrough
CT: control target
= control target key end

     0   :  { %12 = vsyncpa [#allocation3], 0  ;;  %s531_s0 = inlined_call_operand.hbm [shape: f32[2,8], index: 0, kind: input, shape index: {}]   ;;  %s532_s1 = inlined_call_operand.vmem [shape: f32[8,32], index: 1, kind: input, shape index: {}]   ;;  %s533_s2 = inlined_call_operand.vmem [shape: f32[1,32], index: 2, kind: input, shape index: {}]   ;;  %s534_s3 = inlined_call_operand.vmem [shape: f32[32,32], index: 3, kind: input, shape index: {}]   ;;  %s535_s4 = inlined_call_operand.hbm [shape: f32[1,32], index: 4, kind: input, shape index: {}]   ;;  %s536_s5 = inlined_call_operand.vmem [shape: f32[32,4], index: 5, kind: input, shape index: {}]   ;;  %s537_s6 = inlined_call_operand.vmem [shape: f32[1,4], index: 6, kind: input, shape index: {}]   ;;  %s538_s7 = inlined_call_operand.hbm [shape: f32[2,4], index: 7, kind: output, shape index: {}]  }
   0x1   :  { %13 = vsyncpa [#allocation6], 0 }
   0x2   :  { %14 = vsyncpa [#allocation4], 0  ;;  %s442_s24 = smov [#allocation2]   ;;  %s443_s26 = smov [#allocation5]  }
   0x3   :  { %s21_s25 = sshll.u32 %s442_s24, 4  ;;  %s37_s27 = sshll.u32 %s443_s26, 4  ;;  %s22_s25 = int_to_ptr.vmem [resolvable:$true] %s21_s25  ;;  %s38_s27 = int_to_ptr.vmem [resolvable:$true] %s37_s27 }
   0x4   :  { %s384_s28 = scalar_lea.vmem %s22_s25, 32  ;;  %p389_p1 = scmp.lt.s32.totalorder %s22_s25, %s22_s25 }
   0x5   :  { %p385_p0 = scmp.ne.s32.totalorder %s22_s25, %s384_s28  ;;  %p390_p2 = scmp.lt.s32.totalorder %s384_s28, %s384_s28 }
   0x7   :  { %p391_p3 = por %p390_p2, %p389_p1 }
   0x9   :  { %p392_p4 = pnand %p391_p3, %p385_p0 }
   0xb   :  { %395 = shalt.err (!%p392_p4)
}
   0xc   :  { %24 = dma.hbm_to_vmem [thread:$0]  %s531_s0, 32, %s22_s25, [#allocation3]  }
   0xd   :  { %s404_s8 = scalar_lea.vmem %s38_s27, 16  ;;  %s408_s9 = scalar_lea.vmem %s38_s27, 32 }
   0xe   :  { %p405_p5 = scmp.ne.s32.totalorder %s38_s27, %s404_s8  ;;  %p409_p6 = scmp.lt.s32.totalorder %s38_s27, %s38_s27 }
   0xf   :  { %p410_p7 = scmp.lt.s32.totalorder %s408_s9, %s404_s8 }
  0x11   :  { %p411_p8 = por %p410_p7, %p409_p6 }
  0x13   :  { %p412_p9 = pnand %p411_p8, %p405_p5 }
  0x15   :  { %415 = shalt.err (!%p412_p9)
}
  0x16   :  { %40 = dma.hbm_to_vmem [thread:$0]  %s535_s4, 16, %s38_s27, [#allocation6]  }
  0x17   :  { %436 = dma.done.wait [#allocation3], 32  }
  0x18   :  { %437 = vsyncadd [#allocation3], 4294967264 }
  0x19   :  { %438 = dma.done.wait [#allocation6], 16  }
  0x1a   :  { %439 = vsyncadd [#allocation6], 4294967280  ;;  %v444_v0 = vmov 0.0   ;;  %vm445_vm0 = vmmov 0   ;;  %vm60_vm1 = vcmask 64512   ;;  %v52_v1 = vld [vmem:[%s532_s1] sm:$0xff] }
  0x1b   :  { %342 = vmatprep.subr.mxu0 %v444_v0  ;;  %344 = vmatprep.mubr.msk.f32.mxu0 %vm445_vm0, %v444_v0  ;;  %v51_v2 = vld [vmem:[#allocation2] sm:$0x3]  ;;  %v138_v3 = vld [vmem:[%s534_s3 + $0x18] sm:$0xff]  ;;  %v137_v4 = vld [vmem:[%s534_s3 + $0x10] sm:$0xff]  ;;  %vm146_vm2 = vcmask 261120   ;;  %s446_s29 = smov [#allocation7]  }
  0x1c   :  { %347 = vmatprep.subr.mxu1 %v444_v0  ;;  %355 = vmatprep.mubr.msk.f32.mxu1 %vm445_vm0, %v444_v0  ;;  %v136_v5 = vld [vmem:[%s534_s3 + $0x8] sm:$0xff]  ;;  %v135_v6 = vld [vmem:[%s534_s3] sm:$0xff]  ;;  %v224_v7 = vld [vmem:[%s536_s5 + $0x18] sm:$0xff]  ;;  %s314_s30 = sshll.u32 %s446_s29, 4  ;;  %vm306_vm3 = vcmask 25600   ;;  %s315_s30 = int_to_ptr.vmem [resolvable:$true] %s314_s30 }
  0x1d   :  { %343 = vmatpush3.msra.mxu0 %v52_v1  ;;  %348 = vmatpush3.msra.mxu1 %v138_v3  ;;  %v324_v8 = vld [vmem:[%s533_s2] ss:$0 sm:$0xff]  ;;  %v223_v13 = vld [vmem:[%s536_s5 + $0x10] sm:$0xff]  ;;  %v222_v14 = vld [vmem:[%s536_s5 + $0x8] sm:$0xff]  ;;  %p421_p11 = scmp.lt.s32.totalorder %s315_s30, %s315_s30 }
  0x1e   :  { %345 = vmatmul.mubr.msk.f32.vlgmr.msra.gmra.mxu0 %vm60_vm1, %v51_v2  ;;  %349 = vmatprep.subr.mxu1 %v444_v0  ;;  %v221_v15 = vld [vmem:[%s536_s5] sm:$0xff]  ;;  %s416_s5 = scalar_lea.vmem %s315_s30, 32 }
  0x1f   :  { %358 = vmatprep.subr.mxu0 %v444_v0  ;;  %366 = vmatprep.mubr.msk.f32.mxu0 %vm445_vm0, %v444_v0  ;;  %v326_v16 = vld [vmem:[#allocation5] ss:$0 sm:$0xff]  ;;  %v328_v21 = vld [vmem:[%s537_s6] ss:$0 sm:$0xff]  ;;  %p417_p10 = scmp.ne.s32.totalorder %s315_s30, %s416_s5  ;;  %p422_p12 = scmp.lt.s32.totalorder %s416_s5, %s416_s5 }
  0x20   :  { %350 = vmatpush3.msra.mxu1 %v137_v4  ;;  %359 = vmatpush3.msra.mxu0 %v224_v7 }
  0x21   :  { %351 = vmatprep.subr.mxu1 %v444_v0  ;;  %360 = vmatprep.subr.mxu0 %v444_v0  ;;  %p423_p13 = por %p422_p12, %p421_p11 }
  0x22   :  { %352 = vmatpush3.msra.mxu1 %v136_v5  ;;  %361 = vmatpush3.msra.mxu0 %v223_v13 }
  0x23   :  { %353 = vmatprep.subr.mxu1 %v444_v0  ;;  %362 = vmatprep.subr.mxu0 %v444_v0  ;;  %p424_p0 = pnand %p423_p13, %p417_p10 }
  0x24   :  { %354 = vmatpush3.msra.mxu1 %v135_v6  ;;  %363 = vmatpush3.msra.mxu0 %v222_v14 }
  0x25   :  { %364 = vmatprep.subr.mxu0 %v444_v0 }
  0x26   :  { %365 = vmatpush3.msra.mxu0 %v221_v15 }
  0xde   :  { %v130_v9 = vpop.f32.mrf.mxu0 }
  0xdf   :  { %v131_v10 = vadd.f32 %v324_v8, %v130_v9 }
  0xe0   :  { %v346_v11 = vpop.f32.mrf.mxu0 }
  0xe1   :  { %v134_v12 = vmax.f32 %v131_v10, 0.0 }
  0xe3   :  { %356 = vmatmul.mubr.msk.f32.vlgmr.msra.gmra.mxu1 %vm146_vm2, %v134_v12 }
 0x1a3   :  { %v216_v17 = vpop.f32.mrf.mxu1 }
 0x1a4   :  { %v217_v18 = vadd.f32 %v326_v16, %v216_v17 }
 0x1a5   :  { %v357_v19 = vpop.f32.mrf.mxu1 }
 0x1a6   :  { %v220_v20 = vmax.f32 %v217_v18, 0.0 }
 0x1a8   :  { %367 = vmatmul.mubr.msk.f32.vlgmr.msra.gmra.mxu0 %vm146_vm2, %v220_v20 }
 0x268   :  { %v301_v22 = vpop.f32.mrf.mxu0 }
 0x269   :  { %v302_v23 = vadd.f32 %v328_v21, %v301_v22 }
 0x26a   :  { %v368_v24 = vpop.f32.mrf.mxu0 }
 0x26b   :  { %374 = vtanh.f32 %v302_v23 }
 0x278   :  { %v375_v25 = vpop.eup %374 }
 0x279   :  { %307 = vst.msk [vmem:[#allocation7] sm:$0x3] %vm306_vm3, %v375_v25 }
 0x27a   :  { %427 = shalt.err (!%p424_p0)
}
 0x27b   :  { %317 = dma.vmem_to_hbm [thread:$0]  %s315_s30, 32, %s538_s7, [#allocation4]  }
 0x27c   :  { %440 = dma.done.wait [#allocation4], 32  }
 0x27d   :  { %441 = vsyncadd [#allocation4], 4294967264 }
 0x27e   :  { %321 = vsyncpa [#allocation3], 1 }
 0x27f   :  { %322 = vsyncpa [#allocation6], 1 }
 0x280   :  { %323 = vsyncpa [#allocation4], 1 }

</bundles_post_ra>
